<compile_context>
chip_gen: v6e
topology: v6e:2x2x1
jax: 0.10.0
libtpu: 0.0.40
codegen_flags: <defaults>
</compile_context>

<pallas_src>
import functools

import jax
import jax.numpy as jnp
from jax.experimental import pallas as pl
from jax.experimental.pallas import tpu as pltpu


def flash_attn_kernel(q_ref, k_ref, v_ref, mask_ref, o_ref, m_sc, l_sc, acc_sc):
    """One (batch, q-tile, kv-tile) grid step.

    q_ref:    [H, tq, d_k]  bf16 (already scaled by 1/sqrt(d_k))
    k_ref:    [H, tk, d_k]  bf16
    v_ref:    [H, tk, d_k]  bf16
    mask_ref: [tq, tk]      int8, nonzero = masked out
    o_ref:    [H, tq, d_k]  bf16 (written on the last kv step)
    scratch:  m_sc/l_sc [H, tq, 1] f32, acc_sc [H, tq, d_k] f32
    """
    ki = pl.program_id(2)

    @pl.when(ki == 0)
    def _init():
        m_sc[...] = jnp.full_like(m_sc, -jnp.inf)
        l_sc[...] = jnp.zeros_like(l_sc)
        acc_sc[...] = jnp.zeros_like(acc_sc)

    # Head-batched QK^T on the MXU with f32 accumulation: [H, tq, tk].
    s = jnp.einsum("hqd,hkd->hqk", q_ref[...], k_ref[...],
                   preferred_element_type=jnp.float32)

    mask = mask_ref[...].astype(jnp.float32)                # [tq, tk]
    s = jnp.where(mask[None, :, :] != 0.0, jnp.float32(-1e9), s)

    # Online softmax update (stats kept in f32).
    m_prev = m_sc[...]
    m_new = jnp.maximum(m_prev, jnp.max(s, axis=-1, keepdims=True))
    alpha = jnp.exp(m_prev - m_new)
    p = jnp.exp(s - m_new)
    l_sc[...] = alpha * l_sc[...] + jnp.sum(p, axis=-1, keepdims=True)
    acc_sc[...] = alpha * acc_sc[...] + jnp.einsum(
        "hqk,hkd->hqd", p.astype(v_ref.dtype), v_ref[...],
        preferred_element_type=jnp.float32)
    m_sc[...] = m_new

    @pl.when(ki == pl.num_programs(2) - 1)
    def _finalize():
        o_ref[...] = (acc_sc[...] * pl.reciprocal(l_sc[...], approx=True)
                      ).astype(o_ref.dtype)


def _vmem_limit_bytes():
    # Raise the scoped-VMEM cap (defaults: 16 MiB v5e / 32 MiB v6e+v7x) while
    # leaving headroom for double buffers; v7x only has 64 MiB physical VMEM.
    try:
        cap = int(pltpu.get_tpu_info().vmem_capacity_bytes)
    except Exception:
        cap = 64 * 1024 * 1024
    return max(32 * 1024 * 1024,
               min(cap - 16 * 1024 * 1024, 100 * 1024 * 1024))


def multi_head_attn(k, v, q, mask, params, *, num_heads,
                    compute_dtype=jnp.bfloat16, block_q=256, block_kv=256):
    """Pallas implementation of MultiHeadAttn.forward (attn_type='dot', eval)."""
    B, S, D = q.shape
    assert D % num_heads == 0
    H = num_heads
    d_k = D // H
    cdt = compute_dtype
    scale = 1.0 / (d_k ** 0.5)

    # ---- Projections as XLA GEMMs ([B*S, D] x [D, D]); results land directly
    # ---- in the head-major [B, H, S, d_k] layout the kernel consumes.
    def project(x, w, b, s_=1.0):
        w_h = (w * s_).reshape(H, d_k, D).astype(cdt)        # [H, d_k, D_in]
        b_h = (b * s_).reshape(1, H, 1, d_k)
        y = jnp.einsum("bsi,hdi->bhsd", x.astype(cdt), w_h,
                       preferred_element_type=jnp.float32) + b_h
        return y.astype(cdt)

    Qh = project(q, params["wq"], params["bq"], s_=scale)    # scale folded in
    Kh = project(k, params["wk"], params["bk"])
    Vh = project(v, params["wv"], params["bv"])
    mask_i8 = mask.astype(jnp.int8)                          # [B, S, S]

    # ---- Sequence tiling (flash-style).  TODO(synk): pad ragged S outside.
    tq = S if S <= block_q else block_q
    tk = S if S <= block_kv else block_kv
    assert S % tq == 0 and S % tk == 0
    grid = (B, S // tq, S // tk)

    ctx = pl.pallas_call(
        flash_attn_kernel,
        out_shape=jax.ShapeDtypeStruct((B, H, S, d_k), cdt),
        grid_spec=pltpu.PrefetchScalarGridSpec(
            num_scalar_prefetch=0,
            grid=grid,
            in_specs=[
                pl.BlockSpec((None, H, tq, d_k), lambda b, qi, ki: (b, 0, qi, 0)),
                pl.BlockSpec((None, H, tk, d_k), lambda b, qi, ki: (b, 0, ki, 0)),
                pl.BlockSpec((None, H, tk, d_k), lambda b, qi, ki: (b, 0, ki, 0)),
                pl.BlockSpec((None, tq, tk),     lambda b, qi, ki: (b, qi, ki)),
            ],
            out_specs=pl.BlockSpec((None, H, tq, d_k),
                                   lambda b, qi, ki: (b, 0, qi, 0)),
            scratch_shapes=[
                pltpu.VMEM((H, tq, 1), jnp.float32),     # running max
                pltpu.VMEM((H, tq, 1), jnp.float32),     # running denominator
                pltpu.VMEM((H, tq, d_k), jnp.float32),   # output accumulator
            ],
        ),
        compiler_params=pltpu.CompilerParams(
            dimension_semantics=("parallel", "parallel", "arbitrary"),
            vmem_limit_bytes=_vmem_limit_bytes(),
        ),
    )(Qh, Kh, Vh, mask_i8)

    # ---- Output projection W_o; the head "concat" is folded into the GEMM.
    wo_h = params["wo"].reshape(D, H, d_k).astype(cdt)       # [D_out, H, d_k]
    out = jnp.einsum("bhsd,ohd->bso", ctx, wo_h,
                     preferred_element_type=jnp.float32) + params["bo"]
    return out.astype(q.dtype)


def reference_mha(k, v, q, mask, params, *, num_heads):
    """Pure-JAX reference mirroring the PyTorch forward (dot attention, eval)."""
    B, S, D = q.shape
    d_k = D // num_heads

    def lin(x, w, b):
        return x @ w.T + b

    def split(x):
        return x.reshape(B, S, num_heads, d_k).transpose(0, 2, 1, 3)

    Q = split(lin(q, params["wq"], params["bq"]))
    K = split(lin(k, params["wk"], params["bk"]))
    V = split(lin(v, params["wv"], params["bv"]))

    qk = jnp.einsum("bhqd,bhkd->bhqk", Q, K) / jnp.sqrt(jnp.float32(d_k))
    qk = jnp.where(mask[:, None, :, :], -1e9, qk)
    p = jax.nn.softmax(qk, axis=-1)
    ctx = jnp.einsum("bhqk,bhkd->bhqd", p, V)
    ctx = ctx.transpose(0, 2, 1, 3).reshape(B, S, D)
    return lin(ctx, params["wo"], params["bo"])


if __name__ == "__main__":
    B, S, d_model, num_heads = 2, 8, 32, 4

    key = jax.random.PRNGKey(0)
    keys = jax.random.split(key, 12)

    def linear_init(kw, kb, fan_in, shape_w, shape_b):
        bound = 1.0 / (fan_in ** 0.5)
        w = jax.random.uniform(kw, shape_w, jnp.float32, -bound, bound)
        b = jax.random.uniform(kb, shape_b, jnp.float32, -bound, bound)
        return w, b

    wq, bq = linear_init(keys[0], keys[1], d_model, (d_model, d_model), (d_model,))
    wk, bk = linear_init(keys[2], keys[3], d_model, (d_model, d_model), (d_model,))
    wv, bv = linear_init(keys[4], keys[5], d_model, (d_model, d_model), (d_model,))
    wo, bo = linear_init(keys[6], keys[7], d_model, (d_model, d_model), (d_model,))
    params = dict(wq=wq, bq=bq, wk=wk, bk=bk, wv=wv, bv=bv, wo=wo, bo=bo)

    q = jax.random.normal(keys[8], (B, S, d_model), jnp.float32)
    k = jax.random.normal(keys[9], (B, S, d_model), jnp.float32)
    v = jax.random.normal(keys[10], (B, S, d_model), jnp.float32)
    # boolean mask [B, S, S]; True positions are masked out (causal upper tri)
    mask = jnp.broadcast_to(
        jnp.triu(jnp.ones((S, S), dtype=bool), k=1)[None, :, :], (B, S, S))

    mha = jax.jit(functools.partial(multi_head_attn, num_heads=num_heads))
    out = mha(k, v, q, mask, params)
    out = jax.block_until_ready(out)

    ref = reference_mha(k, v, q, mask, params, num_heads=num_heads)
    assert out.shape == (B, S, d_model)
    # bf16 matmul operands (f32 accumulation/stats) -> relaxed tolerance vs f32 ref
    assert jnp.allclose(out, ref, atol=5e-2, rtol=5e-2), "mismatch vs reference"

    print("KERNEL_OK")
</pallas_src>

<mosaic_0001>
module attributes {stable_mosaic.version = 11 : i64} {
  func.func @flash_attn_kernel(%arg0: i32, %arg1: i32, %arg2: i32, %arg3: memref<1x4x8x8xbf16, #tpu.memory_space<vmem>>, %arg4: memref<1x4x8x8xbf16, #tpu.memory_space<vmem>>, %arg5: memref<1x4x8x8xbf16, #tpu.memory_space<vmem>>, %arg6: memref<1x8x8xi8, #tpu.memory_space<vmem>>, %arg7: memref<1x4x8x8xbf16, #tpu.memory_space<vmem>>, %arg8: memref<4x8x1xf32, #tpu.memory_space<vmem>>, %arg9: memref<4x8x1xf32, #tpu.memory_space<vmem>>, %arg10: memref<4x8x8xf32, #tpu.memory_space<vmem>>) attributes {dimension_semantics = [#tpu.dimension_semantics<parallel>, #tpu.dimension_semantics<parallel>, #tpu.dimension_semantics<arbitrary>], iteration_bounds = array<i64: 2, 1, 1>, scalar_prefetch = 0 : i64, scratch_operands = 3 : i64, tpu.core_type = #tpu.core_type<tc>, window_params = [{transform_indices = @transform_0, window_bounds = array<i64: 1, 4, 8, 8>}, {transform_indices = @transform_1, window_bounds = array<i64: 1, 4, 8, 8>}, {transform_indices = @transform_2, window_bounds = array<i64: 1, 4, 8, 8>}, {transform_indices = @transform_3, window_bounds = array<i64: 1, 8, 8>}, {transform_indices = @transform_4, window_bounds = array<i64: 1, 4, 8, 8>}]} {
    %c0_i32 = arith.constant 0 : i32
    %0 = arith.cmpi eq, %arg2, %c0_i32 : i32
    %1 = arith.extui %0 : i1 to i32
    %c0_i32_0 = arith.constant 0 : i32
    %2 = arith.cmpi ne, %1, %c0_i32_0 : i32
    scf.if %2 {
      %cst_40 = arith.constant 0xFF800000 : f32
      %46 = vector.broadcast %cst_40 : f32 to vector<4x8x1xf32>
      %c0_41 = arith.constant 0 : index
      %c0_42 = arith.constant 0 : index
      %c0_43 = arith.constant 0 : index
      %47 = vector.load %arg8[%c0_41, %c0_42, %c0_43] : memref<4x8x1xf32, #tpu.memory_space<vmem>>, vector<4x8x1xf32>
      tpu.vector_store %arg8[%c0_41, %c0_42, %c0_43], %46 {strides = array<i32>} : memref<4x8x1xf32, #tpu.memory_space<vmem>>, vector<4x8x1xf32>,
      %cst_44 = arith.constant 0.000000e+00 : f32
      %48 = vector.broadcast %cst_44 : f32 to vector<4x8x1xf32>
      %c0_45 = arith.constant 0 : index
      %c0_46 = arith.constant 0 : index
      %c0_47 = arith.constant 0 : index
      %49 = vector.load %arg9[%c0_45, %c0_46, %c0_47] : memref<4x8x1xf32, #tpu.memory_space<vmem>>, vector<4x8x1xf32>
      tpu.vector_store %arg9[%c0_45, %c0_46, %c0_47], %48 {strides = array<i32>} : memref<4x8x1xf32, #tpu.memory_space<vmem>>, vector<4x8x1xf32>,
      %cst_48 = arith.constant 0.000000e+00 : f32
      %50 = vector.broadcast %cst_48 : f32 to vector<4x8x8xf32>
      %c0_49 = arith.constant 0 : index
      %c0_50 = arith.constant 0 : index
      %c0_51 = arith.constant 0 : index
      %51 = vector.load %arg10[%c0_49, %c0_50, %c0_51] : memref<4x8x8xf32, #tpu.memory_space<vmem>>, vector<4x8x8xf32>
      tpu.vector_store %arg10[%c0_49, %c0_50, %c0_51], %50 {strides = array<i32>} : memref<4x8x8xf32, #tpu.memory_space<vmem>>, vector<4x8x8xf32>,
    } else {
    }
    %c0 = arith.constant 0 : index
    %c0_1 = arith.constant 0 : index
    %c0_2 = arith.constant 0 : index
    %c0_3 = arith.constant 0 : index
    %3 = vector.load %arg3[%c0, %c0_1, %c0_2, %c0_3] : memref<1x4x8x8xbf16, #tpu.memory_space<vmem>>, vector<1x4x8x8xbf16>
    %4 = vector.shape_cast %3 : vector<1x4x8x8xbf16> to vector<4x8x8xbf16>
    %c0_4 = arith.constant 0 : index
    %c0_5 = arith.constant 0 : index
    %c0_6 = arith.constant 0 : index
    %c0_7 = arith.constant 0 : index
    %5 = vector.load %arg4[%c0_4, %c0_5, %c0_6, %c0_7] : memref<1x4x8x8xbf16, #tpu.memory_space<vmem>>, vector<1x4x8x8xbf16>
    %6 = vector.shape_cast %5 : vector<1x4x8x8xbf16> to vector<4x8x8xbf16>
    "tpu.trace_start"() <{level = 10 : i32, message = "hqd,hkd->hqk"}> : () -> ()
    %cst = arith.constant dense<0.000000e+00> : vector<4x8x8xf32>
    %7 = tpu.matmul %4, %6, %cst {dimension_numbers = #tpu.dot_dimension_numbers<[2], [2], [1], [1], [0, 0, 0, 1, 1, 1], [0], [0]>} : vector<4x8x8xbf16>, vector<4x8x8xbf16>, vector<4x8x8xf32> -> vector<4x8x8xf32>
    "tpu.trace_stop"() : () -> ()
    %c0_8 = arith.constant 0 : index
    %c0_9 = arith.constant 0 : index
    %c0_10 = arith.constant 0 : index
    %8 = vector.load %arg6[%c0_8, %c0_9, %c0_10] : memref<1x8x8xi8, #tpu.memory_space<vmem>>, vector<1x8x8xi8>
    %9 = vector.shape_cast %8 : vector<1x8x8xi8> to vector<8x8xi8>
    %10 = arith.sitofp %9 : vector<8x8xi8> to vector<8x8xf32>
    %11 = vector.shape_cast %10 : vector<8x8xf32> to vector<1x8x8xf32>
    %cst_11 = arith.constant 0.000000e+00 : f32
    %12 = vector.broadcast %cst_11 : f32 to vector<1x8x8xf32>
    %13 = arith.cmpf one, %11, %12 : vector<1x8x8xf32>
    %cst_12 = arith.constant -1.000000e+09 : f32
    %14 = vector.shape_cast %13 : vector<1x8x8xi1> to vector<1x8x8xi1>
    %15 = vector.broadcast %14 : vector<1x8x8xi1> to vector<4x8x8xi1>
    %16 = vector.broadcast %cst_12 : f32 to vector<4x8x8xf32>
    %17 = arith.select %15, %16, %7 : vector<4x8x8xi1>, vector<4x8x8xf32>
    %c0_13 = arith.constant 0 : index
    %c0_14 = arith.constant 0 : index
    %c0_15 = arith.constant 0 : index
    %18 = vector.load %arg8[%c0_13, %c0_14, %c0_15] : memref<4x8x1xf32, #tpu.memory_space<vmem>>, vector<4x8x1xf32>
    %cst_16 = arith.constant dense<0xFF800000> : vector<4x8xf32>
    %19 = vector.multi_reduction <maximumf>, %17, %cst_16 [2] : vector<4x8x8xf32> to vector<4x8xf32>
    %20 = vector.shape_cast %19 : vector<4x8xf32> to vector<4x8x1xf32>
    %21 = arith.maximumf %18, %20 : vector<4x8x1xf32>
    %22 = arith.subf %18, %21 : vector<4x8x1xf32>
    %23 = math.exp %22 : vector<4x8x1xf32>
    %24 = vector.broadcast %21 : vector<4x8x1xf32> to vector<4x8x8xf32>
    %25 = arith.subf %17, %24 : vector<4x8x8xf32>
    %26 = math.exp %25 : vector<4x8x8xf32>
    %c0_17 = arith.constant 0 : index
    %c0_18 = arith.constant 0 : index
    %c0_19 = arith.constant 0 : index
    %27 = vector.load %arg9[%c0_17, %c0_18, %c0_19] : memref<4x8x1xf32, #tpu.memory_space<vmem>>, vector<4x8x1xf32>
    %28 = arith.mulf %23, %27 : vector<4x8x1xf32>
    %cst_20 = arith.constant dense<0.000000e+00> : vector<4x8xf32>
    %29 = vector.multi_reduction <add>, %26, %cst_20 [2] : vector<4x8x8xf32> to vector<4x8xf32>
    %30 = vector.shape_cast %29 : vector<4x8xf32> to vector<4x8x1xf32>
    %31 = arith.addf %28, %30 : vector<4x8x1xf32>
    %c0_21 = arith.constant 0 : index
    %c0_22 = arith.constant 0 : index
    %c0_23 = arith.constant 0 : index
    %32 = vector.load %arg9[%c0_21, %c0_22, %c0_23] : memref<4x8x1xf32, #tpu.memory_space<vmem>>, vector<4x8x1xf32>
    tpu.vector_store %arg9[%c0_21, %c0_22, %c0_23], %31 {strides = array<i32>} : memref<4x8x1xf32, #tpu.memory_space<vmem>>, vector<4x8x1xf32>,
    %c0_24 = arith.constant 0 : index
    %c0_25 = arith.constant 0 : index
    %c0_26 = arith.constant 0 : index
    %33 = vector.load %arg10[%c0_24, %c0_25, %c0_26] : memref<4x8x8xf32, #tpu.memory_space<vmem>>, vector<4x8x8xf32>
    %34 = vector.broadcast %23 : vector<4x8x1xf32> to vector<4x8x8xf32>
    %35 = arith.mulf %34, %33 : vector<4x8x8xf32>
    %36 = arith.truncf %26 : vector<4x8x8xf32> to vector<4x8x8xbf16>
    %c0_27 = arith.constant 0 : index
    %c0_28 = arith.constant 0 : index
    %c0_29 = arith.constant 0 : index
    %c0_30 = arith.constant 0 : index
    %37 = vector.load %arg5[%c0_27, %c0_28, %c0_29, %c0_30] : memref<1x4x8x8xbf16, #tpu.memory_space<vmem>>, vector<1x4x8x8xbf16>
    %38 = vector.shape_cast %37 : vector<1x4x8x8xbf16> to vector<4x8x8xbf16>
    "tpu.trace_start"() <{level = 10 : i32, message = "hqk,hkd->hqd"}> : () -> ()
    %cst_31 = arith.constant dense<0.000000e+00> : vector<4x8x8xf32>
    %39 = tpu.matmul %36, %38, %cst_31 {dimension_numbers = #tpu.dot_dimension_numbers<[2], [1], [1], [2], [0, 0, 0, 1, 1, 2], [0], [0]>} : vector<4x8x8xbf16>, vector<4x8x8xbf16>, vector<4x8x8xf32> -> vector<4x8x8xf32>
    "tpu.trace_stop"() : () -> ()
    %40 = arith.addf %35, %39 : vector<4x8x8xf32>
    %c0_32 = arith.constant 0 : index
    %c0_33 = arith.constant 0 : index
    %c0_34 = arith.constant 0 : index
    %41 = vector.load %arg10[%c0_32, %c0_33, %c0_34] : memref<4x8x8xf32, #tpu.memory_space<vmem>>, vector<4x8x8xf32>
    tpu.vector_store %arg10[%c0_32, %c0_33, %c0_34], %40 {strides = array<i32>} : memref<4x8x8xf32, #tpu.memory_space<vmem>>, vector<4x8x8xf32>,
    %c0_35 = arith.constant 0 : index
    %c0_36 = arith.constant 0 : index
    %c0_37 = arith.constant 0 : index
    %42 = vector.load %arg8[%c0_35, %c0_36, %c0_37] : memref<4x8x1xf32, #tpu.memory_space<vmem>>, vector<4x8x1xf32>
    tpu.vector_store %arg8[%c0_35, %c0_36, %c0_37], %21 {strides = array<i32>} : memref<4x8x1xf32, #tpu.memory_space<vmem>>, vector<4x8x1xf32>,
    %c0_i32_38 = arith.constant 0 : i32
    %43 = arith.cmpi eq, %arg2, %c0_i32_38 : i32
    %44 = arith.extui %43 : i1 to i32
    %c0_i32_39 = arith.constant 0 : i32
    %45 = arith.cmpi ne, %44, %c0_i32_39 : i32
    scf.if %45 {
      %c0_40 = arith.constant 0 : index
      %c0_41 = arith.constant 0 : index
      %c0_42 = arith.constant 0 : index
      %46 = vector.load %arg10[%c0_40, %c0_41, %c0_42] : memref<4x8x8xf32, #tpu.memory_space<vmem>>, vector<4x8x8xf32>
      %c0_43 = arith.constant 0 : index
      %c0_44 = arith.constant 0 : index
      %c0_45 = arith.constant 0 : index
      %47 = vector.load %arg9[%c0_43, %c0_44, %c0_45] : memref<4x8x1xf32, #tpu.memory_space<vmem>>, vector<4x8x1xf32>
      %48 = tpu.reciprocal %47 {approx = true} : vector<4x8x1xf32> -> vector<4x8x1xf32>
      %49 = vector.broadcast %48 : vector<4x8x1xf32> to vector<4x8x8xf32>
      %50 = arith.mulf %46, %49 : vector<4x8x8xf32>
      %51 = arith.truncf %50 : vector<4x8x8xf32> to vector<4x8x8xbf16>
      %c0_46 = arith.constant 0 : index
      %c0_47 = arith.constant 0 : index
      %c0_48 = arith.constant 0 : index
      %c0_49 = arith.constant 0 : index
      %52 = vector.load %arg7[%c0_46, %c0_47, %c0_48, %c0_49] : memref<1x4x8x8xbf16, #tpu.memory_space<vmem>>, vector<1x4x8x8xbf16>
      %53 = vector.shape_cast %52 : vector<1x4x8x8xbf16> to vector<4x8x8xbf16>
      %54 = vector.shape_cast %51 : vector<4x8x8xbf16> to vector<1x4x8x8xbf16>
      tpu.vector_store %arg7[%c0_46, %c0_47, %c0_48, %c0_49], %54 {strides = array<i32>} : memref<1x4x8x8xbf16, #tpu.memory_space<vmem>>, vector<1x4x8x8xbf16>,
    } else {
    }
    return
  }
  func.func @transform_0(%arg0: i32, %arg1: i32, %arg2: i32) -> (i32, i32, i32, i32) {
    %c0_i32 = arith.constant 0 : i32
    %c0_i32_0 = arith.constant 0 : i32
    %c0_i32_1 = arith.constant 0 : i32
    return %arg0, %c0_i32, %arg1, %c0_i32_0 : i32, i32, i32, i32
  }
  func.func @transform_1(%arg0: i32, %arg1: i32, %arg2: i32) -> (i32, i32, i32, i32) {
    %c0_i32 = arith.constant 0 : i32
    %c0_i32_0 = arith.constant 0 : i32
    %c0_i32_1 = arith.constant 0 : i32
    return %arg0, %c0_i32, %arg2, %c0_i32_0 : i32, i32, i32, i32
  }
  func.func @transform_2(%arg0: i32, %arg1: i32, %arg2: i32) -> (i32, i32, i32, i32) {
    %c0_i32 = arith.constant 0 : i32
    %c0_i32_0 = arith.constant 0 : i32
    %c0_i32_1 = arith.constant 0 : i32
    return %arg0, %c0_i32, %arg2, %c0_i32_0 : i32, i32, i32, i32
  }
  func.func @transform_3(%arg0: i32, %arg1: i32, %arg2: i32) -> (i32, i32, i32) {
    %c0_i32 = arith.constant 0 : i32
    return %arg0, %arg1, %arg2 : i32, i32, i32
  }
  func.func @transform_4(%arg0: i32, %arg1: i32, %arg2: i32) -> (i32, i32, i32, i32) {
    %c0_i32 = arith.constant 0 : i32
    %c0_i32_0 = arith.constant 0 : i32
    %c0_i32_1 = arith.constant 0 : i32
    return %arg0, %c0_i32, %arg1, %c0_i32_0 : i32, i32, i32, i32
  }
}

</mosaic_0001>

<bundles_post_ra>
// kernel: multi_head_attn.1
= control target key start
LH: loop header
LB: loop body
LE: loop exit
PB: predicated region body
PF: predicated region fallthrough
CT: control target
= control target key end

     0   :  { %s1272_s15 = smov 0   ;;  %s1274_s16 = smov 0   ;;  %s1466_s0 = inlined_call_operand.vmem [shape: bf16[2,4,8,8], index: 0, kind: input, shape index: {}]   ;;  %s1467_s1 = inlined_call_operand.vmem [shape: bf16[2,4,8,8], index: 1, kind: input, shape index: {}]   ;;  %s1468_s2 = inlined_call_operand.vmem [shape: bf16[2,4,8,8], index: 2, kind: input, shape index: {}]   ;;  %s1469_s3 = inlined_call_operand.vmem [shape: s8[2,8,8], index: 3, kind: input, shape index: {}]   ;;  %s1470_s4 = inlined_call_operand.vmem [shape: bf16[2,4,8,8], index: 4, kind: output, shape index: {}]  }
   0x1   :  { %s1276_s17 = smov 0  }
   0x2 LB: > { %s33_s18 = sadd.s32 1, %s1237_s16  ;;  %p1077_p0 = scmp.ge.s32.totalorder %s1241_s17, 1  ;;  %s1241_s17 = sphi %s1276_s17, %s14_s17   ;;  %s1237_s16 = sphi %s1274_s16, %s1472_s16   ;;  %s1233_s15 = sphi %s1272_s15, %s1471_s15  }
   0x3   : > { %p35_p1 = scmp.ge.s32.totalorder %s33_s18, 2  ;;  %p237_p2 = scmp.lt.s32.totalorder %s1241_s17, 3 }
   0x5   : > { %s1474_s18 = smov (%p35_p1, %s33_s18), 0  ;;  %p238_p3 = pnand %p1077_p0, %p237_p2 }
   0x6   : > { %p295_p4 = scmp.lt.s32.totalorder (!%p238_p3), %s1233_s15, 1 }
   0x7   : > { %241 = sbr.rel (%p238_p3) target bundleno = 805 (0x325), region = 36 }
   0xc   : > { %vm351_vm0 = vcmask 64512   ;;  %v1243_v0 = vmov 0.0   ;;  %s1476_s15 = smov (!%p295_p4, %s1233_s15), 1  ;;  %vm1244_vm1 = vmmov 0   ;;  %vm342_vm2 = vcmask 7168  }
   0xd   : > { %1117 = vmatprep.subr.bf16.mxu0 %v1243_v0  ;;  %1123 = vmatprep.subr.bf16.mxu1 %v1243_v0  ;;  %352 = vst.msk [vmem:[#allocation4] sm:$0xff] %vm351_vm0, %v1243_v0  ;;  %353 = vst.msk [vmem:[#allocation4 + $0x8] sm:$0xff] %vm351_vm0, %v1243_v0  ;;  %s1307_s19 = sshll.u32 %s1476_s15, 4  ;;  %v1245_v13 = vmov -inf   ;;  %s1084_s26 = sshll.u32 %s1476_s15, 1  ;;  %v1246_v41 = vmov 0  }
   0xe   : > { %354 = vst.msk [vmem:[#allocation4 + $0x10] sm:$0xff] %vm351_vm0, %v1243_v0  ;;  %355 = vst.msk [vmem:[#allocation4 + $0x18] sm:$0xff] %vm351_vm0, %v1243_v0  ;;  %1119 = vmatprep.mubr.msk.bf16.mxu0 %vm1244_vm1, %v1243_v0  ;;  %1125 = vmatprep.mubr.msk.bf16.mxu1 %vm1244_vm1, %v1243_v0  ;;  %s310_s22 = scalar_lea.vmem %s1467_s1, %s1307_s19  ;;  %s302_s25 = scalar_lea.vmem %s1466_s0, %s1307_s19  ;;  %vm691_vm4 = vcmask 1043456   ;;  %vm928_vm5 = vcmask 60416  }
   0xf   : > { %v360_v1 = vld [vmem:[%s310_s22] sm:$0xf]  ;;  %v361_v2 = vld [vmem:[%s310_s22 + $0x4] sm:$0xf]  ;;  %v362_v5 = vld [vmem:[%s310_s22 + $0x8] sm:$0xf]  ;;  %s328_s29 = scalar_lea.vmem %s1469_s3, %s1084_s26  ;;  %1193 = vset.pattern.permute.xlu0 %v1246_v41  ;;  %1194 = vset.pattern.permute.xlu1 %v1246_v41  ;;  %s318_s6 = scalar_lea.vmem %s1468_s2, %s1307_s19 }
  0x10   : > { %v369_v3 = vsel %vm351_vm0, %v360_v1, 0  ;;  %v415_v4 = vsel %vm351_vm0, %v361_v2, 0  ;;  %v363_v6 = vld [vmem:[%s310_s22 + $0xc] sm:$0xf]  ;;  %v356_v7 = vld [vmem:[%s302_s25] sm:$0xf]  ;;  %s336_s9 = scalar_lea.vmem %s1470_s4, %s1307_s19 }
  0x11   : > { %1118 = vmatpush3.bf16.xpose.msra.mxu0 %v369_v3  ;;  %1124 = vmatpush3.bf16.xpose.msra.mxu1 %v415_v4  ;;  %v357_v8 = vld [vmem:[%s302_s25 + $0x4] sm:$0xf]  ;;  %v461_v9 = vsel %vm351_vm0, %v362_v5, 0  ;;  %v507_v10 = vsel %vm351_vm0, %v363_v6, 0  ;;  %v358_v11 = vld [vmem:[%s302_s25 + $0x8] sm:$0xf] }
  0x12   : > { %1129 = vmatprep.subr.bf16.mxu0 %v1243_v0  ;;  %1135 = vmatprep.subr.bf16.mxu1 %v1243_v0  ;;  %v359_v12 = vld [vmem:[%s302_s25 + $0xc] sm:$0xf]  ;;  %343 = vst.msk [vmem:[#allocation2] sm:$0xff] %vm342_vm2, %v1245_v13  ;;  %344 = vst.msk [vmem:[#allocation2 + $0x8] sm:$0xff] %vm342_vm2, %v1245_v13  ;;  %v549_v14 = vld [vmem:[%s328_s29] sm:$0x3] }
  0x13   : > { %345 = vst.msk [vmem:[#allocation2 + $0x10] sm:$0xff] %vm342_vm2, %v1245_v13  ;;  %346 = vst.msk [vmem:[#allocation2 + $0x18] sm:$0xff] %vm342_vm2, %v1245_v13  ;;  %v550_v15 = vunpack.c.0.s8 %v549_v14  ;;  %v684_v57 = vld [vmem:[%s318_s6] sm:$0xf]  ;;  %v685_v60 = vld [vmem:[%s318_s6 + $0x4] sm:$0xf] }
  0x14   : > { %347 = vst.msk [vmem:[#allocation3] sm:$0xff] %vm342_vm2, %v1243_v0  ;;  %348 = vst.msk [vmem:[#allocation3 + $0x8] sm:$0xff] %vm342_vm2, %v1243_v0  ;;  %v693_v59 = vsel %vm691_vm4, %v684_v57, 0  ;;  %v739_v61 = vsel %vm691_vm4, %v685_v60, 0  ;;  %v686_v62 = vld [vmem:[%s318_s6 + $0x8] sm:$0xf] }
  0x15   : > { %349 = vst.msk [vmem:[#allocation3 + $0x10] sm:$0xff] %vm342_vm2, %v1243_v0  ;;  %350 = vst.msk [vmem:[#allocation3 + $0x18] sm:$0xff] %vm342_vm2, %v1243_v0  ;;  %v551_v16 = vcvt.s32.f32 %v550_v15  ;;  %v785_v63 = vsel %vm691_vm4, %v686_v62, 0  ;;  %v687_v1 = vld [vmem:[%s318_s6 + $0xc] sm:$0xf] }
  0x16   : > { %v831_v2 = vsel %vm691_vm4, %v687_v1, 0 }
  0x17   : > { %vm552_vm3 = vcmp.ne.f32.partialorder %v551_v16, 0.0 }
  0x18   : > { %1120 = vmatmul.mubr.msk.bf16.vlgmr.msra.gmra.mxu0 %vm351_vm0, %v356_v7  ;;  %1126 = vmatmul.mubr.msk.bf16.vlgmr.msra.gmra.mxu1 %vm351_vm0, %v357_v8 }
  0x19   : > { %1130 = vmatpush3.bf16.xpose.msra.mxu0 %v461_v9  ;;  %1136 = vmatpush3.bf16.xpose.msra.mxu1 %v507_v10  ;;  %v1373_v42 = vld [vmem:[#allocation2] sm:$0xff]  ;;  %v1378_v45 = vld [vmem:[#allocation2 + $0x8] sm:$0xff] }
  0x1a   : > { %1131 = vmatprep.mubr.msk.bf16.mxu0 %vm1244_vm1, %v1243_v0  ;;  %1137 = vmatprep.mubr.msk.bf16.mxu1 %vm1244_vm1, %v1243_v0  ;;  %v1388_v49 = vld [vmem:[#allocation2 + $0x10] sm:$0xff]  ;;  %v1398_v53 = vld [vmem:[#allocation2 + $0x18] sm:$0xff] }
  0x1b   : > { %1141 = vmatprep.subr.bf16.mxu0 %v1243_v0  ;;  %1147 = vmatprep.subr.bf16.mxu1 %v1243_v0 }
  0x1c   : > { %v625_v41 = vld [vmem:[#allocation3 + $0x10] sm:$0xff] }
  0x20   : > { %1132 = vmatmul.mubr.msk.bf16.vlgmr.msra.gmra.mxu0 %vm351_vm0, %v358_v11  ;;  %1138 = vmatmul.mubr.msk.bf16.vlgmr.msra.gmra.mxu1 %vm351_vm0, %v359_v12 }
  0x21   : > { %1143 = vmatprep.mubr.msk.bf16.mxu0 %vm1244_vm1, %v1243_v0  ;;  %1149 = vmatprep.mubr.msk.bf16.mxu1 %vm1244_vm1, %v1243_v0 }
  0x22   : > { %1142 = vmatpush3.bf16.msra.mxu0 %v693_v59  ;;  %1148 = vmatpush3.bf16.msra.mxu1 %v739_v61  ;;  %v652_v59 = vld [vmem:[#allocation4] sm:$0xff]  ;;  %v653_v61 = vld [vmem:[#allocation4 + $0x8] sm:$0xff] }
  0x23   : > { %1153 = vmatprep.subr.bf16.mxu0 %v1243_v0  ;;  %1159 = vmatprep.subr.bf16.mxu1 %v1243_v0 }
  0xd8   : > { %v405_v17 = vpop.f32.mrf.mxu0  ;;  %v451_v18 = vpop.f32.mrf.mxu1 }
  0xd9   : > { %v1354_v19 = vsel %vm552_vm3, -1e+09, %v405_v17  ;;  %v1357_v20 = vsel %vm552_vm3, -1e+09, %v451_v18 }
  0xda   : > { %v1121_v21 = vpop.f32.mrf.mxu0  ;;  %v1127_v22 = vpop.f32.mrf.mxu1  ;;  %v563_v23 = vsel %vm351_vm0, %v1354_v19, -inf  ;;  %v566_v26 = vsel %vm351_vm0, %v1357_v20, -inf }
  0xdb   : > { %564 = vmax.xlane.f32.xlu0 %v563_v23 }
  0xdc   : > { %v408_v24 = vpop.f32.mrf.mxu0  ;;  %v454_v25 = vpop.f32.mrf.mxu1 }
  0xde   : > { %v1122_v27 = vpop.f32.mrf.mxu0  ;;  %v1128_v28 = vpop.f32.mrf.mxu1 }
  0xdf   : > { %567 = vmax.xlane.f32.xlu0 %v566_v26 }
  0xe0   : > { %v497_v29 = vpop.f32.mrf.mxu0  ;;  %v543_v30 = vpop.f32.mrf.mxu1 }
  0xe1   : > { %v1364_v31 = vsel %vm552_vm3, -1e+09, %v497_v29  ;;  %v1367_v32 = vsel %vm552_vm3, -1e+09, %v543_v30 }
  0xe2   : > { %v1133_v33 = vpop.f32.mrf.mxu0  ;;  %v1139_v34 = vpop.f32.mrf.mxu1  ;;  %v569_v35 = vsel %vm351_vm0, %v1364_v31, -inf  ;;  %v572_v38 = vsel %vm351_vm0, %v1367_v32, -inf }
  0xe3   : > { %570 = vmax.xlane.f32.xlu1 %v569_v35  ;;  %v623_v34 = vld [vmem:[#allocation3] sm:$0xff] }
  0xe4   : > { %v500_v36 = vpop.f32.mrf.mxu0  ;;  %v546_v37 = vpop.f32.mrf.mxu1 }
  0xe5   : > { %v624_v37 = vld [vmem:[#allocation3 + $0x8] sm:$0xff] }
  0xe6   : > { %v1134_v39 = vpop.f32.mrf.mxu0  ;;  %v1140_v40 = vpop.f32.mrf.mxu1 }
  0xe7   : > { %573 = vmax.xlane.f32.xlu1 %v572_v38 }
 0x164   : > { %v565_v43 = vpop.xlane.xlu0 %564 }
 0x165   : > { %v1376_v44 = vmax.f32 %v1373_v42, %v565_v43 }
 0x167   : > { %v579_v46 = vsub.f32 %v1373_v42, %v1376_v44  ;;  %881 = vst.msk [vmem:[#allocation2] sm:$0xff] %vm342_vm2, %v1376_v44  ;;  %593 = vperm.xlu0 %1193, %v1376_v44  }
 0x168   : > { %v568_v47 = vpop.xlane.xlu0 %567 }
 0x169   : > { %v1386_v48 = vmax.f32 %v1378_v45, %v568_v47  ;;  %v583_v26 = vmul.f32 1.442695, %v579_v46 }
 0x16b   : > { %v580_v50 = vsub.f32 %v1378_v45, %v1386_v48  ;;  %882 = vst.msk [vmem:[#allocation2 + $0x8] sm:$0xff] %vm342_vm2, %v1386_v48  ;;  %598 = vperm.xlu1 %1194, %v1386_v48   ;;  %v626_v45 = vld [vmem:[#allocation3 + $0x18] sm:$0xff] }
 0x16c   : > { %v571_v51 = vpop.xlane.xlu1 %570 }
 0x16d   : > { %v1396_v52 = vmax.f32 %v1388_v49, %v571_v51  ;;  %v585_v24 = vmul.f32 1.442695, %v580_v50 }
 0x16f   : > { %v581_v54 = vsub.f32 %v1388_v49, %v1396_v52  ;;  %883 = vst.msk [vmem:[#allocation2 + $0x10] sm:$0xff] %vm342_vm2, %v1396_v52  ;;  %603 = vperm.xlu1 %1194, %v1396_v52  }
 0x170   : > { %v574_v55 = vpop.xlane.xlu1 %573 }
 0x171   : > { %v1406_v56 = vmax.f32 %v1398_v53, %v574_v55 }
 0x173   : > { %v582_v58 = vsub.f32 %v1398_v53, %v1406_v56  ;;  %884 = vst.msk [vmem:[#allocation2 + $0x18] sm:$0xff] %vm342_vm2, %v1406_v56  ;;  %608 = vperm.xlu1 %1194, %v1406_v56  }
 0x175   : > { %v589_v29 = vmul.f32 1.442695, %v582_v58 }
 0x1e2   : > { %v594_v3 = vpop.permute.xlu0 %593 }
 0x1e3   : > { %v611_v4 = vsub.f32 %v1354_v19, %v594_v3 }
 0x1e5   : > { %v615_v5 = vmul.f32 1.442695, %v611_v4 }
 0x1e6   : > { %v599_v6 = vpop.permute.xlu1 %598 }
 0x1e7   : > { %1195 = vpow2.f32 %v615_v5  ;;  %v612_v7 = vsub.f32 %v1357_v20, %v599_v6  ;;  %v654_v5 = vld [vmem:[#allocation4 + $0x10] sm:$0xff] }
 0x1e9   : > { %v617_v8 = vmul.f32 1.442695, %v612_v7 }
 0x1ea   : > { %v604_v9 = vpop.permute.xlu1 %603 }
 0x1eb   : > { %1197 = vpow2.f32 %v617_v8  ;;  %v613_v10 = vsub.f32 %v1364_v31, %v604_v9 }
 0x1ed   : > { %v619_v11 = vmul.f32 1.442695, %v613_v10 }
 0x1ee   : > { %v609_v12 = vpop.permute.xlu1 %608 }
 0x1ef   : > { %1199 = vpow2.f32 %v619_v11  ;;  %v614_v13 = vsub.f32 %v1367_v32, %v609_v12 }
 0x1f1   : > { %v621_v14 = vmul.f32 1.442695, %v614_v13  ;;  %v655_v13 = vld [vmem:[#allocation4 + $0x18] sm:$0xff] }
 0x1f3   : > { %1201 = vpow2.f32 %v621_v14 }
 0x1f4   : > { %v1196_v15 = vpop.eup %1195  ;;  %1203 = vpow2.f32 %v585_v24 }
 0x1f5   : > { %v631_v16 = vsel %vm351_vm0, %v1196_v15, 0.0  ;;  %v680_v17 = vpack.c.bf16 %v1196_v15, %v1196_v15  ;;  %1205 = vpow2.f32 %v583_v26 }
 0x1f6   : > { %632 = vadd.xlane.f32.xlu1 %v631_v16 }
 0x1f7   : > { %1144 = vmatmul.mubr.msk.bf16.vlgmr.msra.gmra.mxu0 %vm351_vm0, %v680_v17 }
 0x1f8   : > { %v1198_v18 = vpop.eup %1197  ;;  %1154 = vmatpush3.bf16.msra.mxu0 %v785_v63  ;;  %1155 = vmatprep.mubr.msk.bf16.mxu0 %vm1244_vm1, %v1243_v0 }
 0x1f9   : > { %v634_v19 = vsel %vm351_vm0, %v1198_v18, 0.0  ;;  %v681_v20 = vpack.c.bf16 %v1198_v18, %v1198_v18 }
 0x1fa   : > { %635 = vadd.xlane.f32.xlu0 %v634_v19 }
 0x1fb   : > { %1150 = vmatmul.mubr.msk.bf16.vlgmr.msra.gmra.mxu1 %vm351_vm0, %v681_v20 }
 0x1fc   : > { %v1200_v21 = vpop.eup %1199  ;;  %1160 = vmatpush3.bf16.msra.mxu1 %v831_v2  ;;  %1161 = vmatprep.mubr.msk.bf16.mxu1 %vm1244_vm1, %v1243_v0  ;;  %v587_v0 = vmul.f32 1.442695, %v581_v54 }
 0x1fd   : > { %v637_v22 = vsel %vm351_vm0, %v1200_v21, 0.0  ;;  %v682_v23 = vpack.c.bf16 %v1200_v21, %v1200_v21 }
 0x1fe   : > { %638 = vadd.xlane.f32.xlu1 %v637_v22  ;;  %1207 = vpow2.f32 %v587_v0 }
 0x1ff   : > { %1156 = vmatmul.mubr.msk.bf16.vlgmr.msra.gmra.mxu0 %vm351_vm0, %v682_v23  ;;  %1209 = vpow2.f32 %v589_v29 }
 0x200   : > { %v1202_v25 = vpop.eup %1201 }
 0x201   : > { %v640_v27 = vsel %vm351_vm0, %v1202_v25, 0.0  ;;  %v683_v28 = vpack.c.bf16 %v1202_v25, %v1202_v25  ;;  %v1204_v30 = vpop.eup %1203 }
 0x202   : > { %641 = vadd.xlane.f32.xlu1 %v640_v27  ;;  %v1206_v31 = vpop.eup %1205  ;;  %v628_v39 = vmul.f32 %v1204_v30, %v624_v37 }
 0x203   : > { %1162 = vmatmul.mubr.msk.bf16.vlgmr.msra.gmra.mxu1 %vm351_vm0, %v683_v28  ;;  %v627_v35 = vmul.f32 %v1206_v31, %v623_v34 }
 0x20b   : > { %v1208_v32 = vpop.eup %1207 }
 0x20c   : > { %v1210_v33 = vpop.eup %1209  ;;  %v629_v43 = vmul.f32 %v1208_v32, %v625_v41 }
 0x20d   : > { %v630_v48 = vmul.f32 %v1210_v33, %v626_v45 }
 0x210   : > { %663 = vperm.xlu0 %1193, %v1204_v30  }
 0x213   : > { %658 = vperm.xlu1 %1194, %v1206_v31  }
 0x217   : > { %668 = vperm.xlu1 %1194, %v1208_v32  }
 0x21b   : > { %673 = vperm.xlu1 %1194, %v1210_v33  }
 0x27f   : > { %v633_v36 = vpop.xlane.xlu1 %632 }
 0x280   : > { %v643_v38 = vadd.f32 %v633_v36, %v627_v35 }
 0x282   : > { %648 = vst.msk [vmem:[#allocation3] sm:$0xff] %vm342_vm2, %v643_v38 }
 0x283   : > { %v636_v40 = vpop.xlane.xlu0 %635 }
 0x284   : > { %v644_v42 = vadd.f32 %v636_v40, %v628_v39 }
 0x286   : > { %649 = vst.msk [vmem:[#allocation3 + $0x8] sm:$0xff] %vm342_vm2, %v644_v42 }
 0x287   : > { %v639_v44 = vpop.xlane.xlu1 %638 }
 0x288   : > { %v645_v46 = vadd.f32 %v639_v44, %v629_v43 }
 0x289   : > { %v892_v47 = vld [vmem:[#allocation3] sm:$0xff] }
 0x28a   : > { %650 = vst.msk [vmem:[#allocation3 + $0x10] sm:$0xff] %vm342_vm2, %v645_v46  ;;  %1211 = vrcp.f32 %v892_v47 }
 0x28b   : > { %v642_v49 = vpop.xlane.xlu1 %641  ;;  %v664_v62 = vpop.permute.xlu0 %663 }
 0x28c   : > { %v646_v50 = vadd.f32 %v642_v49, %v630_v48  ;;  %v677_v4 = vmul.f32 %v664_v62, %v653_v61 }
 0x28d   : > { %v893_v51 = vld [vmem:[#allocation3 + $0x8] sm:$0xff] }
 0x28e   : > { %651 = vst.msk [vmem:[#allocation3 + $0x18] sm:$0xff] %vm342_vm2, %v646_v50  ;;  %1213 = vrcp.f32 %v893_v51 }
 0x28f   : > { %v659_v58 = vpop.permute.xlu1 %658 }
 0x290   : > { %v676_v60 = vmul.f32 %v659_v58, %v652_v59 }
 0x291   : > { %v894_v52 = vld [vmem:[#allocation3 + $0x10] sm:$0xff] }
 0x292   : > { %1215 = vrcp.f32 %v894_v52 }
 0x293   : > { %v669_v1 = vpop.permute.xlu1 %668 }
 0x294   : > { %v678_v11 = vmul.f32 %v669_v1, %v654_v5 }
 0x295   : > { %v895_v53 = vld [vmem:[#allocation3 + $0x18] sm:$0xff] }
 0x296   : > { %1217 = vrcp.f32 %v895_v53 }
 0x297   : > { %v1212_v54 = vpop.eup %1211  ;;  %v674_v12 = vpop.permute.xlu1 %673 }
 0x298   : > { %902 = vperm.xlu1 %1194, %v1212_v54   ;;  %v679_v19 = vmul.f32 %v674_v12, %v655_v13 }
 0x29b   : > { %v1214_v55 = vpop.eup %1213 }
 0x29c   : > { %907 = vperm.xlu0 %1193, %v1214_v55  }
 0x29f   : > { %v1216_v56 = vpop.eup %1215 }
 0x2a0   : > { %912 = vperm.xlu1 %1194, %v1216_v56  }
 0x2a3   : > { %v1218_v57 = vpop.eup %1217 }
 0x2a4   : > { %917 = vperm.xlu0 %1193, %v1218_v57  }
 0x2b7   : > { %v729_v63 = vpop.f32.mrf.mxu0 }
 0x2b8   : > { %v873_v2 = vadd.f32 %v729_v63, %v676_v60 }
 0x2b9   : > { %v1145_v3 = vpop.f32.mrf.mxu0 }
 0x2ba   : > { %877 = vst.msk [vmem:[#allocation4] sm:$0xff] %vm351_vm0, %v873_v2 }
 0x2bb   : > { %v732_v6 = vpop.f32.mrf.mxu0  ;;  %v775_v7 = vpop.f32.mrf.mxu1 }
 0x2bc   : > { %v874_v8 = vadd.f32 %v775_v7, %v677_v4 }
 0x2bd   : > { %v1146_v9 = vpop.f32.mrf.mxu0  ;;  %v1151_v10 = vpop.f32.mrf.mxu1 }
 0x2be   : > { %878 = vst.msk [vmem:[#allocation4 + $0x8] sm:$0xff] %vm351_vm0, %v874_v8 }
 0x2bf   : > { %v778_v14 = vpop.f32.mrf.mxu1  ;;  %v821_v15 = vpop.f32.mrf.mxu0 }
 0x2c0   : > { %v875_v16 = vadd.f32 %v821_v15, %v678_v11 }
 0x2c1   : > { %v1152_v17 = vpop.f32.mrf.mxu1  ;;  %v1157_v18 = vpop.f32.mrf.mxu0  ;;  %v888_v28 = vld [vmem:[#allocation4] sm:$0xff] }
 0x2c2   : > { %879 = vst.msk [vmem:[#allocation4 + $0x10] sm:$0xff] %vm351_vm0, %v875_v16 }
 0x2c3   : > { %v824_v20 = vpop.f32.mrf.mxu0  ;;  %v867_v21 = vpop.f32.mrf.mxu1 }
 0x2c4   : > { %v876_v22 = vadd.f32 %v867_v21, %v679_v19 }
 0x2c5   : > { %v1158_v23 = vpop.f32.mrf.mxu0  ;;  %v1163_v24 = vpop.f32.mrf.mxu1  ;;  %v889_v30 = vld [vmem:[#allocation4 + $0x8] sm:$0xff] }
 0x2c6   : > { %880 = vst.msk [vmem:[#allocation4 + $0x18] sm:$0xff] %vm351_vm0, %v876_v22 }
 0x2c7   : > { %v870_v25 = vpop.f32.mrf.mxu1 }
 0x2c9   : > { %v1164_v26 = vpop.f32.mrf.mxu1  ;;  %v890_v35 = vld [vmem:[#allocation4 + $0x10] sm:$0xff] }
 0x2cd   : > { %v891_v39 = vld [vmem:[#allocation4 + $0x18] sm:$0xff] }
 0x313   : > { %v903_v27 = vpop.permute.xlu1 %902 }
 0x314   : > { %v920_v0 = vmul.f32 %v903_v27, %v888_v28 }
 0x316   : > { %v924_v29 = vpack.c.bf16 %v920_v0, %v920_v0 }
 0x317   : > { %v908_v31 = vpop.permute.xlu0 %907 }
 0x318   : > { %929 = vst.msk [vmem:[%s336_s9] sm:$0xf] %vm928_vm5, %v924_v29  ;;  %v921_v32 = vmul.f32 %v908_v31, %v889_v30 }
 0x31a   : > { %v925_v33 = vpack.c.bf16 %v921_v32, %v921_v32 }
 0x31b   : > { %v913_v34 = vpop.permute.xlu1 %912 }
 0x31c   : > { %930 = vst.msk [vmem:[%s336_s9 + $0x4] sm:$0xf] %vm928_vm5, %v925_v33  ;;  %v922_v36 = vmul.f32 %v913_v34, %v890_v35 }
 0x31e   : > { %v926_v37 = vpack.c.bf16 %v922_v36, %v922_v36 }
 0x31f   : > { %v918_v38 = vpop.permute.xlu0 %917 }
 0x320   : > { %931 = vst.msk [vmem:[%s336_s9 + $0x8] sm:$0xf] %vm928_vm5, %v926_v37  ;;  %v923_v40 = vmul.f32 %v918_v38, %v891_v39 }
 0x322   : > { %v927_v41 = vpack.c.bf16 %v923_v40, %v923_v40 }
 0x324   : > { %932 = vst.msk [vmem:[%s336_s9 + $0xc] sm:$0xf] %vm928_vm5, %v927_v41 }
 0x325 PF: > { %s14_s17 = sadd.s32 1, %s1241_s17   ;;  %s1471_s15 = smov %s1237_s16 }
 0x326   : > { %p11_p5 = scmp.ge.s32.totalorder %s14_s17, 4   ;;  %s1472_s16 = smov %s1474_s18 }
 0x328   :  { %13 = sbr.rel (!%p11_p5) target bundleno = 2 (0x2), region = 83 }

</bundles_post_ra>
